<compile_context>
chip_gen: v7x
topology: tpu7x:2x2x1
jax: 0.10.0
libtpu: 0.0.40
codegen_flags: <defaults>
</compile_context>

<pallas_src>
import functools

import jax
import jax.numpy as jnp
from jax.experimental import pallas as pl
from jax.experimental.pallas import tpu as pltpu

LANE = 128  # TPU lane width; class dim is padded to this.


def base_kernel(x_ref, w_ref, b_ref, lbl_ref, pred_ref, ploss_ref, *, tn, n_valid):
    # x_ref:    (TN, D)     f32   raw (un-normalized) flattened image tile
    # w_ref:    (D, Kp)     bf16  normalize-folded, zero-padded weight (invariant)
    # b_ref:    (1, Kp)     f32   normalize-folded bias; padded cols = -1e30 (invariant)
    # lbl_ref:  (TN, 1)     i32   integer labels for this tile
    # pred_ref: (TN, Kp)    bf16  logits out (halved writeback)
    # ploss_ref:(8, LANE)   f32   per-tile partial CE sum (broadcast over the block)
    i = pl.program_id(0)

    # In-kernel bf16 cast (VPU, hidden under the x-tile DMA), then MXU matmul with
    # f32 accumulate:  model(Normalize(x)) == x @ W' + b'
    x = x_ref[...].astype(jnp.bfloat16)
    logits = jnp.dot(x, w_ref[...], preferred_element_type=jnp.float32) + b_ref[...]
    pred_ref[...] = logits.astype(pred_ref.dtype)

    # --- cross-entropy epilogue (all f32, VPU/EUP; large slack vs. HBM DMA) ---
    m = jnp.max(logits, axis=-1, keepdims=True)                          # (TN, 1)
    lse = m + jnp.log(jnp.sum(jnp.exp(logits - m), axis=-1, keepdims=True))

    # Gather correct-class logit with an iota==label mask (no one-hot input).
    k_iota = jax.lax.broadcasted_iota(jnp.int32, logits.shape, 1)        # (TN, Kp)
    corr = jnp.sum(jnp.where(k_iota == lbl_ref[...], logits, 0.0),
                   axis=-1, keepdims=True)                               # (TN, 1)
    nll = lse - corr                                                     # (TN, 1)

    # Mask rows beyond the true batch (edge tile reads garbage there) out of the sum.
    row = jax.lax.broadcasted_iota(jnp.int32, nll.shape, 0)              # (TN, 1)
    valid = (i * tn + row) < n_valid
    part = jnp.sum(jnp.where(valid, nll, 0.0))

    # Lane-dense partial-loss store; wrapper reduces and divides by true N.
    ploss_ref[...] = jnp.broadcast_to(part, (8, LANE)).astype(jnp.float32)


def fold_params(mean_c, std_c, w, b, hw, num_classes):
    """One-time, per-weight-set: fold Normalize into the classifier and pad to 128 lanes.

    Hoisted out of the per-batch hot path (runs once; results are reused).
    Assumes NCHW flattening, i.e. x.reshape(N, C*H*W); `hw` = H*W.
    """
    D, K = w.shape
    assert K == num_classes
    mean_flat = jnp.repeat(mean_c.astype(jnp.float32), hw)               # (D,)
    std_flat = jnp.repeat(std_c.astype(jnp.float32), hw)                 # (D,)
    inv_std = 1.0 / std_flat
    w32 = w.astype(jnp.float32)
    w_fold = w32 * inv_std[:, None]                                      # (D, K)
    b_fold = b.astype(jnp.float32) - (mean_flat * inv_std) @ w32         # (K,)

    # Pad class dim to 128 lanes: zero weight cols, -1e30 bias (finite in bf16 too).
    w_pad = jnp.concatenate(
        [w_fold, jnp.zeros((D, LANE - K), jnp.float32)], axis=1).astype(jnp.bfloat16)
    b_pad = jnp.concatenate(
        [b_fold.reshape(1, K), jnp.full((1, LANE - K), -1e30, jnp.float32)], axis=1)
    return w_pad, b_pad


@functools.partial(jax.jit, static_argnames=("num_classes",))
def base_forward(x_nchw, labels, w_pad, b_pad, num_classes):
    """Hot path: one fused jitted program feeding a single pallas_call."""
    N = x_nchw.shape[0]
    D = w_pad.shape[0]
    K = num_classes

    x2d = x_nchw.reshape(N, D)                       # free bitcast, stays f32 in HBM
    labels2d = labels.astype(jnp.int32).reshape(N, 1)

    # Batch tile: big enough to amortize ~0.35us/grid-step, small enough that the
    # f32 x double-buffer (2 * TN * D * 4B) stays inside the 32 MiB scoped VMEM we
    # request (safe on v5e/v6e/v7x). Keep >=2 tiles when possible so v7x's two
    # TensorCores both get work via dimension_semantics=("parallel",).
    if N > 1024:
        TN = 512
    else:
        TN = min(512, max(8, ((pl.cdiv(N, 2) + 7) // 8) * 8))
    num_tiles = pl.cdiv(N, TN)
    N_out = num_tiles * TN  # pred rows beyond N are garbage; sliced off below

    kernel = functools.partial(base_kernel, tn=TN, n_valid=N)

    grid_spec = pltpu.PrefetchScalarGridSpec(
        num_scalar_prefetch=0,
        grid=(num_tiles,),
        in_specs=[
            pl.BlockSpec((TN, D), lambda i: (i, 0)),      # x tile (double-buffered)
            pl.BlockSpec((D, LANE), lambda i: (0, 0)),    # W' invariant block
            pl.BlockSpec((1, LANE), lambda i: (0, 0)),    # b' invariant block
            pl.BlockSpec((TN, 1), lambda i: (i, 0)),      # labels tile
        ],
        out_specs=(
            pl.BlockSpec((TN, LANE), lambda i: (i, 0)),   # bf16 logits tile
            pl.BlockSpec((8, LANE), lambda i: (i, 0)),    # per-tile partial loss
        ),
    )

    pred_pad, ploss = pl.pallas_call(
        kernel,
        out_shape=(
            jax.ShapeDtypeStruct((N_out, LANE), jnp.bfloat16),
            jax.ShapeDtypeStruct((num_tiles * 8, LANE), jnp.float32),
        ),
        grid_spec=grid_spec,
        compiler_params=pltpu.CompilerParams(
            dimension_semantics=("parallel",),            # shard batch tiles across TCs
            vmem_limit_bytes=32 * 1024 * 1024,
        ),
    )(x2d, w_pad, b_pad, labels2d)

    pred = pred_pad[:N, :K].astype(jnp.float32)
    loss = ploss.reshape(num_tiles, 8, LANE)[:, 0, 0].sum() / N
    return {"pred": pred, "loss": loss}


# TODO(synk): training-path augmentations (RandomHorizontalFlip / reflect-pad
# RandomCrop) are data-dependent image ops with no clean Pallas equivalent here;
# only the eval/test path (Normalize -> model -> loss) is implemented.


if __name__ == "__main__":
    # Small CIFAR10-like configuration (eval/test path of Base).
    N, C, H, W = 2, 3, 32, 32
    num_classes = 10
    D = C * H * W

    key = jax.random.PRNGKey(0)
    kx, kw, kb, kl = jax.random.split(key, 4)

    x = jax.random.uniform(kx, (N, C, H, W), dtype=jnp.float32)          # 'data'
    labels = jax.random.randint(kl, (N,), 0, num_classes)                # 'target'

    # CIFAR10 stats (deterministic constants).
    mean_c = jnp.array([0.4914, 0.4822, 0.4465], dtype=jnp.float32)
    std_c = jnp.array([0.2470, 0.2435, 0.2616], dtype=jnp.float32)

    # Deterministic synthetic model parameters (linear classifier).
    w = jax.random.normal(kw, (D, num_classes), dtype=jnp.float32) * 0.02
    b = jax.random.normal(kb, (num_classes,), dtype=jnp.float32) * 0.01

    # One-time fold/pad (hoisted out of the per-batch hot path).
    w_pad, b_pad = fold_params(mean_c, std_c, w, b, H * W, num_classes)

    out = base_forward(x, labels, w_pad, b_pad, num_classes)
    jax.block_until_ready(out)

    # Reference check in plain JAX (original un-folded, full-f32 semantics).
    x_norm = (x - mean_c[None, :, None, None]) / std_c[None, :, None, None]
    logits_ref = jnp.dot(x_norm.reshape(N, D), w,
                         precision=jax.lax.Precision.HIGHEST) + b
    lse_ref = jax.nn.logsumexp(logits_ref, axis=-1)
    loss_ref = jnp.mean(lse_ref - logits_ref[jnp.arange(N), labels])
    # bf16 MXU inputs + bf16 pred store -> modest tolerance vs. the full-f32 reference.
    assert jnp.allclose(out["pred"], logits_ref, atol=1e-1, rtol=5e-2)
    assert jnp.allclose(out["loss"], loss_ref, atol=5e-2, rtol=5e-2)

    print("KERNEL_OK")
</pallas_src>

<mosaic_0001>
module attributes {stable_mosaic.version = 11 : i64} {
  func.func @base_kernel(%arg0: i32, %arg1: memref<8x3072xf32, #tpu.memory_space<vmem>>, %arg2: memref<3072x128xbf16, #tpu.memory_space<vmem>>, %arg3: memref<1x128xf32, #tpu.memory_space<vmem>>, %arg4: memref<8x1xi32, #tpu.memory_space<vmem>>, %arg5: memref<8x128xbf16, #tpu.memory_space<vmem>>, %arg6: memref<8x128xf32, #tpu.memory_space<vmem>>) attributes {dimension_semantics = [#tpu.dimension_semantics<parallel>], iteration_bounds = array<i64: 1>, scalar_prefetch = 0 : i64, scratch_operands = 0 : i64, tpu.core_type = #tpu.core_type<tc>, window_params = [{transform_indices = @transform_0, window_bounds = array<i64: 8, 3072>}, {pipeline_mode = #tpu.pipeline_mode<synchronous>, transform_indices = @transform_1, window_bounds = array<i64: 3072, 128>}, {pipeline_mode = #tpu.pipeline_mode<synchronous>, transform_indices = @transform_2, window_bounds = array<i64: 1, 128>}, {transform_indices = @transform_3, window_bounds = array<i64: 8, 1>}, {transform_indices = @transform_4, window_bounds = array<i64: 8, 128>}, {transform_indices = @transform_5, window_bounds = array<i64: 8, 128>}]} {
    %c0 = arith.constant 0 : index
    %c0_0 = arith.constant 0 : index
    %0 = vector.load %arg1[%c0, %c0_0] : memref<8x3072xf32, #tpu.memory_space<vmem>>, vector<8x3072xf32>
    %1 = arith.truncf %0 : vector<8x3072xf32> to vector<8x3072xbf16>
    %c0_1 = arith.constant 0 : index
    %c0_2 = arith.constant 0 : index
    %2 = vector.load %arg2[%c0_1, %c0_2] : memref<3072x128xbf16, #tpu.memory_space<vmem>>, vector<3072x128xbf16>
    %cst = arith.constant dense<0.000000e+00> : vector<8x128xf32>
    %3 = tpu.matmul %1, %2, %cst {dimension_numbers = #tpu.dot_dimension_numbers<[1], [0], [0], [1], [0, 0, 1, 1], [], []>} : vector<8x3072xbf16>, vector<3072x128xbf16>, vector<8x128xf32> -> vector<8x128xf32>
    %c0_3 = arith.constant 0 : index
    %c0_4 = arith.constant 0 : index
    %4 = vector.load %arg3[%c0_3, %c0_4] : memref<1x128xf32, #tpu.memory_space<vmem>>, vector<1x128xf32>
    %5 = vector.broadcast %4 : vector<1x128xf32> to vector<8x128xf32>
    %6 = arith.addf %3, %5 : vector<8x128xf32>
    %7 = arith.truncf %6 : vector<8x128xf32> to vector<8x128xbf16>
    %c0_5 = arith.constant 0 : index
    %c0_6 = arith.constant 0 : index
    %8 = vector.load %arg5[%c0_5, %c0_6] : memref<8x128xbf16, #tpu.memory_space<vmem>>, vector<8x128xbf16>
    tpu.vector_store %arg5[%c0_5, %c0_6], %7 {strides = array<i32>} : memref<8x128xbf16, #tpu.memory_space<vmem>>, vector<8x128xbf16>,
    %cst_7 = arith.constant dense<0xFF800000> : vector<8xf32>
    %9 = vector.multi_reduction <maximumf>, %6, %cst_7 [1] : vector<8x128xf32> to vector<8xf32>
    %10 = vector.shape_cast %9 : vector<8xf32> to vector<8x1xf32>
    %11 = vector.broadcast %10 : vector<8x1xf32> to vector<8x128xf32>
    %12 = arith.subf %6, %11 : vector<8x128xf32>
    %13 = math.exp %12 : vector<8x128xf32>
    %cst_8 = arith.constant dense<0.000000e+00> : vector<8xf32>
    %14 = vector.multi_reduction <add>, %13, %cst_8 [1] : vector<8x128xf32> to vector<8xf32>
    %15 = vector.shape_cast %14 : vector<8xf32> to vector<8x1xf32>
    %16 = math.log %15 : vector<8x1xf32>
    %17 = arith.addf %10, %16 : vector<8x1xf32>
    %18 = tpu.iota {dimensions = array<i32: 1>} : vector<8x128xi32>
    %c0_9 = arith.constant 0 : index
    %c0_10 = arith.constant 0 : index
    %19 = vector.load %arg4[%c0_9, %c0_10] : memref<8x1xi32, #tpu.memory_space<vmem>>, vector<8x1xi32>
    %20 = vector.broadcast %19 : vector<8x1xi32> to vector<8x128xi32>
    %21 = arith.cmpi eq, %18, %20 : vector<8x128xi32>
    %cst_11 = arith.constant 0.000000e+00 : f32
    %22 = vector.broadcast %cst_11 : f32 to vector<8x128xf32>
    %23 = arith.select %21, %6, %22 : vector<8x128xi1>, vector<8x128xf32>
    %cst_12 = arith.constant dense<0.000000e+00> : vector<8xf32>
    %24 = vector.multi_reduction <add>, %23, %cst_12 [1] : vector<8x128xf32> to vector<8xf32>
    %25 = vector.shape_cast %24 : vector<8xf32> to vector<8x1xf32>
    %26 = arith.subf %17, %25 : vector<8x1xf32>
    %27 = tpu.iota {dimensions = array<i32: 0>} : vector<8x1xi32>
    %c8_i32 = arith.constant 8 : i32
    %28 = arith.muli %arg0, %c8_i32 : i32
    %29 = vector.broadcast %28 : i32 to vector<8x1xi32>
    %30 = arith.addi %29, %27 : vector<8x1xi32>
    %c2_i32 = arith.constant 2 : i32
    %31 = vector.broadcast %c2_i32 : i32 to vector<8x1xi32>
    %32 = arith.cmpi slt, %30, %31 : vector<8x1xi32>
    %cst_13 = arith.constant 0.000000e+00 : f32
    %33 = vector.broadcast %cst_13 : f32 to vector<8x1xf32>
    %34 = arith.select %32, %26, %33 : vector<8x1xi1>, vector<8x1xf32>
    %35 = vector.shape_cast %34 : vector<8x1xf32> to vector<1x8x1xf32>
    %cst_14 = arith.constant dense<0.000000e+00> : vector<1xf32>
    %36 = vector.multi_reduction <add>, %35, %cst_14 [1, 2] : vector<1x8x1xf32> to vector<1xf32>
    %37 = vector.shape_cast %36 : vector<1xf32> to vector<1x1x1xf32>
    %38 = vector.extract %37[0, 0, 0] : f32 from vector<1x1x1xf32>
    %39 = vector.broadcast %38 : f32 to vector<8x128xf32>
    %c0_15 = arith.constant 0 : index
    %c0_16 = arith.constant 0 : index
    %40 = vector.load %arg6[%c0_15, %c0_16] : memref<8x128xf32, #tpu.memory_space<vmem>>, vector<8x128xf32>
    tpu.vector_store %arg6[%c0_15, %c0_16], %39 {strides = array<i32>} : memref<8x128xf32, #tpu.memory_space<vmem>>, vector<8x128xf32>,
    return
  }
  func.func @transform_0(%arg0: i32) -> (i32, i32) {
    %c0_i32 = arith.constant 0 : i32
    %c0_i32_0 = arith.constant 0 : i32
    return %arg0, %c0_i32 : i32, i32
  }
  func.func @transform_1(%arg0: i32) -> (i32, i32) {
    %c0_i32 = arith.constant 0 : i32
    %c0_i32_0 = arith.constant 0 : i32
    %c0_i32_1 = arith.constant 0 : i32
    return %c0_i32, %c0_i32_0 : i32, i32
  }
  func.func @transform_2(%arg0: i32) -> (i32, i32) {
    %c0_i32 = arith.constant 0 : i32
    %c0_i32_0 = arith.constant 0 : i32
    %c0_i32_1 = arith.constant 0 : i32
    return %c0_i32, %c0_i32_0 : i32, i32
  }
  func.func @transform_3(%arg0: i32) -> (i32, i32) {
    %c0_i32 = arith.constant 0 : i32
    %c0_i32_0 = arith.constant 0 : i32
    return %arg0, %c0_i32 : i32, i32
  }
  func.func @transform_4(%arg0: i32) -> (i32, i32) {
    %c0_i32 = arith.constant 0 : i32
    %c0_i32_0 = arith.constant 0 : i32
    return %arg0, %c0_i32 : i32, i32
  }
  func.func @transform_5(%arg0: i32) -> (i32, i32) {
    %c0_i32 = arith.constant 0 : i32
    %c0_i32_0 = arith.constant 0 : i32
    return %arg0, %c0_i32 : i32, i32
  }
}

</mosaic_0001>

<bundles_post_ra>
// kernel: base_forward.1
= control target key start
LH: loop header
LB: loop body
LE: loop exit
PB: predicated region body
PF: predicated region fallthrough
CT: control target
= control target key end

     0   :  { %11 = vsyncpa [#allocation3], 0  ;;  %s3142_s18 = smov [#allocation2]   ;;  %s3305_s0 = inlined_call_operand.vmem [shape: f32[2,3072], index: 0, kind: input, shape index: {}]   ;;  %s3306_s1 = inlined_call_operand.hbm [shape: bf16[3072,128], index: 1, kind: input, shape index: {}]   ;;  %s3307_s2 = inlined_call_operand.vmem [shape: f32[1,128], index: 2, kind: input, shape index: {}]   ;;  %s3308_s3 = inlined_call_operand.vmem [shape: s32[2,1], index: 3, kind: input, shape index: {}]   ;;  %s3309_s4 = inlined_call_operand.vmem [shape: bf16[8,128], index: 4, kind: output, shape index: {0}]   ;;  %s3310_s5 = inlined_call_operand.vmem [shape: f32[8,128], index: 5, kind: output, shape index: {1}]  }
   0x1   :  { %s19_s19 = sshll.u32 %s3142_s18, 4  ;;  %s3118_s22 = scalar_lea.hbm %s3306_s1, 24576  ;;  %s20_s19 = int_to_ptr.vmem [resolvable:$true] %s19_s19 }
   0x2   :  { %p3119_p0 = scmp.ne.s32.totalorder %s3306_s1, %s3118_s22  ;;  %p3122_p1 = scmp.lt.u32.totalorder %s3118_s22, %s3306_s1 }
   0x4   :  { %p3124_p2 = pnand %p3122_p1, %p3119_p0 }
   0x6   :  { %3127 = shalt.err (!%p3124_p2)
}
   0x7   :  { %s3128_s27 = scalar_lea.vmem %s20_s19, 24576  ;;  %p3133_p4 = scmp.lt.s32.totalorder %s20_s19, %s20_s19 }
   0x8   :  { %p3129_p3 = scmp.ne.s32.totalorder %s20_s19, %s3128_s27  ;;  %p3134_p5 = scmp.lt.s32.totalorder %s3128_s27, %s3128_s27 }
   0xa   :  { %p3135_p6 = por %p3134_p5, %p3133_p4 }
   0xc   :  { %p3136_p7 = pnand %p3135_p6, %p3129_p3 }
   0xe   :  { %3139 = shalt.err (!%p3136_p7)
}
   0xf   :  { %s3143_s28 = smov 64   ;;  %s3144_s29 = smov 4  }
  0x10   :  { %25 = dma.hbm_to_vmem [thread:$0]  %s3306_s1, 24576, %s20_s19, [#allocation3], %s3143_s28, %s3143_s28, %s3144_s29  }
  0x11   :  { %3140 = dma.done.wait [#allocation3], 24576  }
  0x12   :  { %3141 = vsyncadd [#allocation3], 4294942720  ;;  %v2886_v0 = vld [vmem:[#allocation2 + $0x40] sm:$0xff]   ;;  %v2890_v4 = vld [vmem:[#allocation2 + $0x48] sm:$0xff]   ;;  %v3145_v24 = vmov 1983009808   ;;  %v89_v26 = vlaneseq }
  0x13   :  { %v2887_v1 = vld [vmem:[#allocation2 + $0xc0] sm:$0xff]   ;;  %2614 = vmatprep.subr.bf16.mxu0 %v2886_v0  ;;  %v2891_v5 = vld [vmem:[#allocation2 + $0xc8] sm:$0xff]   ;;  %v2894_v8 = vld [vmem:[#allocation2 + $0x50] sm:$0xff]   ;;  %v87_v25 = vunpack.c.l.s4 %v3145_v24  ;;  %vm2399_vm2 = vcmask 7168  }
  0x14   :  { %v2888_v2 = vld [vmem:[#allocation2] sm:$0xff]   ;;  %2636 = vmatprep.subr.bf16.mxu1 %v2887_v1  ;;  %v2892_v6 = vld [vmem:[#allocation2 + $0x8] sm:$0xff]   ;;  %v2895_v9 = vld [vmem:[#allocation2 + $0xd0] sm:$0xff]   ;;  %v3190_v32 = vshrl.u32 %v89_v26, 7 }
  0x15   :  { %v2889_v3 = vld [vmem:[#allocation2 + $0x80] sm:$0xff]   ;;  %2615 = vmatpush3.bf16.msra.mxu0 %v2888_v2  ;;  %v2893_v7 = vld [vmem:[#allocation2 + $0x88] sm:$0xff]   ;;  %v2896_v10 = vld [vmem:[#allocation2 + $0x10] sm:$0xff]   ;;  %v88_v31 = vunpack.c.0.s8 %v87_v25 }
  0x16   :  { %2637 = vmatpush3.bf16.msra.mxu1 %v2889_v3  ;;  %2616 = vmatprep.subr.bf16.mxu0 %v2890_v4  ;;  %v2897_v11 = vld [vmem:[#allocation2 + $0x90] sm:$0xff]   ;;  %v2898_v12 = vld [vmem:[#allocation2 + $0x58] sm:$0xff]   ;;  %v2902_v16 = vld [vmem:[#allocation2 + $0x60] sm:$0xff]   ;;  %vm2397_vm1 = vcmp.lt.s32.totalorder %v3190_v32, 2 }
  0x17   :  { %2638 = vmatprep.subr.bf16.mxu1 %v2891_v5  ;;  %v2899_v13 = vld [vmem:[#allocation2 + $0xd8] sm:$0xff]   ;;  %v2903_v17 = vld [vmem:[#allocation2 + $0xe0] sm:$0xff]   ;;  %v2906_v20 = vld [vmem:[#allocation2 + $0x68] sm:$0xff]   ;;  %v3193_v37 = vsub.s32 %v88_v31, %v3190_v32 }
  0x18   :  { %v2900_v14 = vld [vmem:[#allocation2 + $0x18] sm:$0xff]   ;;  %v2904_v18 = vld [vmem:[#allocation2 + $0x20] sm:$0xff]   ;;  %v2907_v21 = vld [vmem:[#allocation2 + $0xe8] sm:$0xff]  }
  0x19   :  { %2617 = vmatpush3.bf16.msra.mxu0 %v2892_v6  ;;  %v2901_v15 = vld [vmem:[#allocation2 + $0x98] sm:$0xff]   ;;  %v2905_v19 = vld [vmem:[#allocation2 + $0xa0] sm:$0xff]   ;;  %v2908_v22 = vld [vmem:[#allocation2 + $0x28] sm:$0xff]  }
  0x1a   :  { %2639 = vmatpush3.bf16.msra.mxu1 %v2893_v7  ;;  %2618 = vmatprep.subr.bf16.mxu0 %v2894_v8  ;;  %v2909_v23 = vld [vmem:[#allocation2 + $0xa8] sm:$0xff]   ;;  %v2910_v27 = vld [vmem:[#allocation2 + $0x70] sm:$0xff]   ;;  %v2914_v33 = vld [vmem:[#allocation2 + $0x78] sm:$0xff]  }
  0x1b   :  { %2640 = vmatprep.subr.bf16.mxu1 %v2895_v9  ;;  %v2911_v28 = vld [vmem:[#allocation2 + $0xf0] sm:$0xff]   ;;  %v2915_v34 = vld [vmem:[#allocation2 + $0xf8] sm:$0xff]   ;;  %v2924_v44 = vld [vmem:[#allocation2 + $0x140] sm:$0xff]  }
  0x1c   :  { %v2912_v29 = vld [vmem:[#allocation2 + $0x30] sm:$0xff]   ;;  %v2916_v35 = vld [vmem:[#allocation2 + $0x38] sm:$0xff]   ;;  %v2925_v47 = vld [vmem:[#allocation2 + $0x1c0] sm:$0xff]  }
  0x1d   :  { %2619 = vmatpush3.bf16.msra.mxu0 %v2896_v10  ;;  %v2913_v30 = vld [vmem:[#allocation2 + $0xb0] sm:$0xff]   ;;  %v2917_v36 = vld [vmem:[#allocation2 + $0xb8] sm:$0xff]   ;;  %v2926_v50 = vld [vmem:[#allocation2 + $0x100] sm:$0xff]  }
  0x1e   :  { %2641 = vmatpush3.bf16.msra.mxu1 %v2897_v11  ;;  %2620 = vmatprep.subr.bf16.mxu0 %v2898_v12  ;;  %v2918_v38 = vld [vmem:[%s3305_s0] ss:$48 sps:$4 sm:$0xff]   ;;  %v2922_v40 = vld [vmem:[%s3305_s0 + $0x4] ss:$48 sps:$4 sm:$0xff]   ;;  %v2928_v56 = vld [vmem:[#allocation2 + $0x148] sm:$0xff]  }
  0x1f   :  { %2642 = vmatprep.subr.bf16.mxu1 %v2899_v13  ;;  %v2920_v39 = vld [vmem:[%s3305_s0 + $0x60] ss:$48 sps:$4 sm:$0xff]   ;;  %v2923_v41 = vld [vmem:[%s3305_s0 + $0x64] ss:$48 sps:$4 sm:$0xff]   ;;  %v92_v42 = vrot.slane %v2918_v38, %v3193_v37  ;;  %v99_v45 = vrot.slane %v2922_v40, %v3193_v37  ;;  %v2929_v59 = vld [vmem:[#allocation2 + $0x1c8] sm:$0xff]  }
  0x20   :  { %v106_v43 = vrot.slane %v2920_v39, %v3193_v37  ;;  %v113_v46 = vrot.slane %v2923_v41, %v3193_v37  ;;  %v2927_v53 = vld [vmem:[#allocation2 + $0x180] sm:$0xff]   ;;  %v2930_v60 = vld [vmem:[#allocation2 + $0x108] sm:$0xff]   ;;  %v2932_v62 = vld [vmem:[#allocation2 + $0x150] sm:$0xff]  }
  0x21   :  { %2621 = vmatpush3.bf16.msra.mxu0 %v2900_v14  ;;  %v2931_v61 = vld [vmem:[#allocation2 + $0x188] sm:$0xff]   ;;  %v2933_v63 = vld [vmem:[#allocation2 + $0x1d0] sm:$0xff]   ;;  %v2936_v2 = vld [vmem:[#allocation2 + $0x158] sm:$0xff]  }
  0x22   :  { %2643 = vmatpush3.bf16.msra.mxu1 %v2901_v15  ;;  %2622 = vmatprep.subr.bf16.mxu0 %v2902_v16  ;;  %v115_v48 = vcombine.high %v92_v42, %v106_v43  ;;  %v114_v49 = vcombine.low %v92_v42, %v106_v43  ;;  %v117_v51 = vcombine.high %v99_v45, %v113_v46  ;;  %v2934_v0 = vld [vmem:[#allocation2 + $0x110] sm:$0xff]   ;;  %v2937_v3 = vld [vmem:[#allocation2 + $0x1d8] sm:$0xff]   ;;  %v2940_v6 = vld [vmem:[#allocation2 + $0x160] sm:$0xff]  }
  0x23   :  { %2644 = vmatprep.subr.bf16.mxu1 %v2903_v17  ;;  %v116_v52 = vcombine.low %v99_v45, %v113_v46  ;;  %v2935_v1 = vld [vmem:[#allocation2 + $0x190] sm:$0xff]   ;;  %v2938_v4 = vld [vmem:[#allocation2 + $0x118] sm:$0xff]   ;;  %v2941_v7 = vld [vmem:[#allocation2 + $0x1e0] sm:$0xff]  }
  0x24   :  { %v323_v54 = vpack.c.bf16 %v115_v48, %v115_v48  ;;  %v322_v55 = vpack.c.bf16 %v114_v49, %v114_v49  ;;  %v325_v57 = vpack.c.bf16 %v117_v51, %v117_v51  ;;  %v2939_v5 = vld [vmem:[#allocation2 + $0x198] sm:$0xff]   ;;  %v2942_v8 = vld [vmem:[#allocation2 + $0x120] sm:$0xff]   ;;  %v2944_v10 = vld [vmem:[#allocation2 + $0x168] sm:$0xff]  }
  0x25   :  { %2623 = vmatpush3.bf16.msra.mxu0 %v2904_v18  ;;  %v324_v58 = vpack.c.bf16 %v116_v52, %v116_v52  ;;  %v2943_v9 = vld [vmem:[#allocation2 + $0x1a0] sm:$0xff]   ;;  %v2945_v11 = vld [vmem:[#allocation2 + $0x1e8] sm:$0xff]   ;;  %v2948_v14 = vld [vmem:[#allocation2 + $0x170] sm:$0xff]  }
  0x26   :  { %2645 = vmatpush3.bf16.msra.mxu1 %v2905_v19  ;;  %2624 = vmatprep.subr.bf16.mxu0 %v2906_v20  ;;  %v2946_v12 = vld [vmem:[#allocation2 + $0x128] sm:$0xff]   ;;  %v2949_v15 = vld [vmem:[#allocation2 + $0x1f0] sm:$0xff]   ;;  %v2952_v18 = vld [vmem:[#allocation2 + $0x178] sm:$0xff]  }
  0x27   :  { %2646 = vmatprep.subr.bf16.mxu1 %v2907_v21  ;;  %1921 = vmatprep.mubr.bf16.mxu0 %v323_v54  ;;  %v2947_v13 = vld [vmem:[#allocation2 + $0x1a8] sm:$0xff]   ;;  %v2950_v16 = vld [vmem:[#allocation2 + $0x130] sm:$0xff]   ;;  %v2953_v19 = vld [vmem:[#allocation2 + $0x1f8] sm:$0xff]  }
  0x28   :  { %1961 = vmatprep.mubr.bf16.mxu1 %v325_v57  ;;  %v2951_v17 = vld [vmem:[#allocation2 + $0x1b0] sm:$0xff]   ;;  %v2954_v20 = vld [vmem:[#allocation2 + $0x138] sm:$0xff]   ;;  %v2965_v40 = vld [vmem:[#allocation2 + $0x280] sm:$0xff]  }
  0x29   :  { %2625 = vmatpush3.bf16.msra.mxu0 %v2908_v22  ;;  %v2955_v21 = vld [vmem:[#allocation2 + $0x1b8] sm:$0xff]   ;;  %v2966_v43 = vld [vmem:[#allocation2 + $0x248] sm:$0xff]   ;;  %v2970_v49 = vld [vmem:[#allocation2 + $0x250] sm:$0xff]  }
  0x2a   :  { %2647 = vmatpush3.bf16.msra.mxu1 %v2909_v23  ;;  %2626 = vmatprep.subr.bf16.mxu0 %v2910_v27  ;;  %v2956_v22 = vld [vmem:[%s3305_s0 + $0x8] ss:$48 sps:$4 sm:$0xff]   ;;  %v2960_v24 = vld [vmem:[%s3305_s0 + $0xc] ss:$48 sps:$4 sm:$0xff]   ;;  %v2972_v51 = vld [vmem:[#allocation2 + $0x210] sm:$0xff]  }
  0x2b   :  { %2648 = vmatprep.subr.bf16.mxu1 %v2911_v28  ;;  %v2958_v23 = vld [vmem:[%s3305_s0 + $0x68] ss:$48 sps:$4 sm:$0xff]   ;;  %v2961_v25 = vld [vmem:[%s3305_s0 + $0x6c] ss:$48 sps:$4 sm:$0xff]   ;;  %v128_v27 = vrot.slane %v2956_v22, %v3193_v37  ;;  %v2973_v52 = vld [vmem:[#allocation2 + $0x290] sm:$0xff]  }
  0x2c   :  { %v142_v28 = vrot.slane %v2958_v23, %v3193_v37  ;;  %v149_v31 = vrot.slane %v2961_v25, %v3193_v37  ;;  %v2967_v46 = vld [vmem:[#allocation2 + $0x2c8] sm:$0xff]   ;;  %v2975_v54 = vld [vmem:[#allocation2 + $0x2d8] sm:$0xff]   ;;  %v2978_v57 = vld [vmem:[#allocation2 + $0x260] sm:$0xff]  }
  0x2d   :  { %2627 = vmatpush3.bf16.msra.mxu0 %v2912_v29  ;;  %v135_v29 = vrot.slane %v2960_v24, %v3193_v37  ;;  %v2969_v48 = vld [vmem:[#allocation2 + $0x288] sm:$0xff]   ;;  %v3002_v23 = vld [vmem:[#allocation2 + $0x300] sm:$0xff]  }
  0x2e   :  { %2649 = vmatpush3.bf16.msra.mxu1 %v2913_v30  ;;  %2628 = vmatprep.subr.bf16.mxu0 %v2914_v33  ;;  %v2962_v30 = vld [vmem:[#allocation2 + $0x240] sm:$0xff]  }
  0x2f   :  { %2650 = vmatprep.subr.bf16.mxu1 %v2915_v34  ;;  %v2963_v33 = vld [vmem:[#allocation2 + $0x2c0] sm:$0xff]   ;;  %v151_v34 = vcombine.high %v128_v27, %v142_v28  ;;  %v153_v38 = vcombine.high %v135_v29, %v149_v31  ;;  %v152_v39 = vcombine.low %v135_v29, %v149_v31  ;;  %v3005_v31 = vld [vmem:[#allocation2 + $0x3c8] sm:$0xff]  }
  0x30   :  { %v3003_v24 = vld [vmem:[#allocation2 + $0x380] sm:$0xff]  }
  0x31   :  { %2629 = vmatpush3.bf16.msra.mxu0 %v2916_v35  ;;  %v150_v35 = vcombine.low %v128_v27, %v142_v28  ;;  %v327_v41 = vpack.c.bf16 %v151_v34, %v151_v34  ;;  %v328_v45 = vpack.c.bf16 %v152_v39, %v152_v39  ;;  %v3007_v34 = vld [vmem:[#allocation2 + $0x388] sm:$0xff]   ;;  %v3011_v39 = vld [vmem:[#allocation2 + $0x390] sm:$0xff]  }
  0x32   :  { %2651 = vmatpush3.bf16.msra.mxu1 %v2917_v36  ;;  %2658 = vmatprep.subr.bf16.mxu0 %v2924_v44  ;;  %v2964_v36 = vld [vmem:[#allocation2 + $0x200] sm:$0xff]   ;;  %v329_v44 = vpack.c.bf16 %v153_v38, %v153_v38  ;;  %v3010_v38 = vld [vmem:[#allocation2 + $0x310] sm:$0xff]  }
  0x33   :  { %2680 = vmatprep.subr.bf16.mxu1 %v2925_v47  ;;  %v326_v42 = vpack.c.bf16 %v150_v35, %v150_v35  ;;  %v2968_v47 = vld [vmem:[#allocation2 + $0x208] sm:$0xff]   ;;  %v3008_v35 = vld [vmem:[#allocation2 + $0x350] sm:$0xff]  }
  0x34   :  { %1922 = vmatmul.mubr.bf16.vlgmr.msra.gmra.mrb[0].mxu0 %v322_v55  ;;  %v2976_v55 = vld [vmem:[#allocation2 + $0x218] sm:$0xff]  }
  0x35   :  { %1962 = vmatmul.mubr.bf16.vlgmr.msra.gmra.mrb[0].mxu1 %v324_v58  ;;  %2659 = vmatpush3.bf16.msra.mxu0 %v2926_v50  ;;  %v2971_v50 = vld [vmem:[#allocation2 + $0x2d0] sm:$0xff]   ;;  %v2979_v58 = vld [vmem:[#allocation2 + $0x2e0] sm:$0xff]  }
  0x36   :  { %2681 = vmatpush3.bf16.msra.mxu1 %v2927_v53  ;;  %2660 = vmatprep.subr.bf16.mxu0 %v2928_v56  ;;  %v2974_v53 = vld [vmem:[#allocation2 + $0x258] sm:$0xff]  }
  0x37   :  { %2682 = vmatprep.subr.bf16.mxu1 %v2929_v59  ;;  %2001 = vmatprep.mubr.bf16.mxu0 %v327_v41  ;;  %v2977_v56 = vld [vmem:[#allocation2 + $0x298] sm:$0xff]   ;;  %v2980_v59 = vld [vmem:[#allocation2 + $0x220] sm:$0xff]  }
  0x38   :  { %2041 = vmatprep.mubr.bf16.mxu1 %v329_v44  ;;  %v3013_v41 = vld [vmem:[#allocation2 + $0x3d8] sm:$0xff]   ;;  %v3016_v44 = vld [vmem:[#allocation2 + $0x360] sm:$0xff]  }
  0x39   :  { %2661 = vmatpush3.bf16.msra.mxu0 %v2930_v60  ;;  %v2981_v60 = vld [vmem:[#allocation2 + $0x2a0] sm:$0xff]  }
  0x3a   :  { %2683 = vmatpush3.bf16.msra.mxu1 %v2931_v61  ;;  %2662 = vmatprep.subr.bf16.mxu0 %v2932_v62  ;;  %v2982_v61 = vld [vmem:[#allocation2 + $0x268] sm:$0xff]  }
  0x3b   :  { %2684 = vmatprep.subr.bf16.mxu1 %v2933_v63  ;;  %v2983_v62 = vld [vmem:[#allocation2 + $0x2e8] sm:$0xff]  }
  0x3c   :  { %v2984_v63 = vld [vmem:[#allocation2 + $0x228] sm:$0xff]  }
  0x3d   :  { %2663 = vmatpush3.bf16.msra.mxu0 %v2934_v0  ;;  %v2985_v0 = vld [vmem:[#allocation2 + $0x2a8] sm:$0xff]  }
  0x3e   :  { %2685 = vmatpush3.bf16.msra.mxu1 %v2935_v1  ;;  %2664 = vmatprep.subr.bf16.mxu0 %v2936_v2  ;;  %v2986_v1 = vld [vmem:[#allocation2 + $0x270] sm:$0xff]  }
  0x3f   :  { %2686 = vmatprep.subr.bf16.mxu1 %v2937_v3  ;;  %v2987_v2 = vld [vmem:[#allocation2 + $0x2f0] sm:$0xff]  }
  0x40   :  { %v2988_v3 = vld [vmem:[#allocation2 + $0x230] sm:$0xff]  }
  0x41   :  { %2665 = vmatpush3.bf16.msra.mxu0 %v2938_v4  ;;  %v2989_v4 = vld [vmem:[#allocation2 + $0x2b0] sm:$0xff]  }
  0x42   :  { %2687 = vmatpush3.bf16.msra.mxu1 %v2939_v5  ;;  %2666 = vmatprep.subr.bf16.mxu0 %v2940_v6  ;;  %v2990_v5 = vld [vmem:[#allocation2 + $0x278] sm:$0xff]  }
  0x43   :  { %2688 = vmatprep.subr.bf16.mxu1 %v2941_v7  ;;  %v2991_v6 = vld [vmem:[#allocation2 + $0x2f8] sm:$0xff]  }
  0x44   :  { %v2992_v7 = vld [vmem:[#allocation2 + $0x238] sm:$0xff]  }
  0x45   :  { %2667 = vmatpush3.bf16.msra.mxu0 %v2942_v8  ;;  %v2993_v8 = vld [vmem:[#allocation2 + $0x2b8] sm:$0xff]  }
  0x46   :  { %2689 = vmatpush3.bf16.msra.mxu1 %v2943_v9  ;;  %2668 = vmatprep.subr.bf16.mxu0 %v2944_v10  ;;  %v2994_v9 = vld [vmem:[%s3305_s0 + $0x10] ss:$48 sps:$4 sm:$0xff]  }
  0x47   :  { %2690 = vmatprep.subr.bf16.mxu1 %v2945_v11  ;;  %v2996_v10 = vld [vmem:[%s3305_s0 + $0x70] ss:$48 sps:$4 sm:$0xff]   ;;  %v2998_v11 = vld [vmem:[%s3305_s0 + $0x14] ss:$48 sps:$4 sm:$0xff]  }
  0x49   :  { %2669 = vmatpush3.bf16.msra.mxu0 %v2946_v12  ;;  %v2999_v12 = vld [vmem:[%s3305_s0 + $0x74] ss:$48 sps:$4 sm:$0xff]  }
  0x4a   :  { %2691 = vmatpush3.bf16.msra.mxu1 %v2947_v13  ;;  %2670 = vmatprep.subr.bf16.mxu0 %v2948_v14  ;;  %v164_v13 = vrot.slane %v2994_v9, %v3193_v37  ;;  %v3000_v14 = vld [vmem:[#allocation2 + $0x340] sm:$0xff]  }
  0x4b   :  { %2692 = vmatprep.subr.bf16.mxu1 %v2949_v15  ;;  %v178_v15 = vrot.slane %v2996_v10, %v3193_v37 }
  0x4d   :  { %2671 = vmatpush3.bf16.msra.mxu0 %v2950_v16  ;;  %v171_v16 = vrot.slane %v2998_v11, %v3193_v37  ;;  %v3041_v11 = vld [vmem:[#allocation2 + $0x480] sm:$0xff]  }
  0x4e   :  { %2693 = vmatpush3.bf16.msra.mxu1 %v2951_v17  ;;  %2672 = vmatprep.subr.bf16.mxu0 %v2952_v18  ;;  %v185_v17 = vrot.slane %v2999_v12, %v3193_v37  ;;  %v3001_v18 = vld [vmem:[#allocation2 + $0x3c0] sm:$0xff]  }
  0x4f   :  { %2694 = vmatprep.subr.bf16.mxu1 %v2953_v19  ;;  %v187_v19 = vcombine.high %v164_v13, %v178_v15 }
  0x50   :  { %v188_v22 = vcombine.low %v171_v16, %v185_v17 }
  0x51   :  { %2673 = vmatpush3.bf16.msra.mxu0 %v2954_v20  ;;  %v189_v20 = vcombine.high %v171_v16, %v185_v17  ;;  %v331_v25 = vpack.c.bf16 %v187_v19, %v187_v19  ;;  %v3043_v17 = vld [vmem:[#allocation2 + $0x4c8] sm:$0xff]  }
  0x52   :  { %2695 = vmatpush3.bf16.msra.mxu1 %v2955_v21  ;;  %2702 = vmatprep.subr.bf16.mxu0 %v2962_v30  ;;  %v186_v21 = vcombine.low %v164_v13, %v178_v15  ;;  %v332_v29 = vpack.c.bf16 %v188_v22, %v188_v22  ;;  %v3004_v30 = vld [vmem:[#allocation2 + $0x348] sm:$0xff]   ;;  %v3048_v22 = vld [vmem:[#allocation2 + $0x410] sm:$0xff]  }
  0x53   :  { %2724 = vmatprep.subr.bf16.mxu1 %v2963_v33  ;;  %v333_v27 = vpack.c.bf16 %v189_v20, %v189_v20  ;;  %v3006_v33 = vld [vmem:[#allocation2 + $0x308] sm:$0xff]   ;;  %v3046_v20 = vld [vmem:[#allocation2 + $0x450] sm:$0xff]  }
  0x54   :  { %2002 = vmatmul.mubr.bf16.vlgmr.msra.gmra.mrb[4].mxu0 %v326_v42  ;;  %v330_v28 = vpack.c.bf16 %v186_v21, %v186_v21  ;;  %v3014_v42 = vld [vmem:[#allocation2 + $0x318] sm:$0xff]   ;;  %v3045_v19 = vld [vmem:[#allocation2 + $0x488] sm:$0xff]   ;;  %v3047_v21 = vld [vmem:[#allocation2 + $0x4d0] sm:$0xff]  }
  0x55   :  { %2042 = vmatmul.mubr.bf16.vlgmr.msra.gmra.mrb[4].mxu1 %v328_v45  ;;  %2703 = vmatpush3.bf16.msra.mxu0 %v2964_v36  ;;  %v3009_v36 = vld [vmem:[#allocation2 + $0x3d0] sm:$0xff]   ;;  %v3017_v45 = vld [vmem:[#allocation2 + $0x3e0] sm:$0xff]  }
  0x56   :  { %2725 = vmatpush3.bf16.msra.mxu1 %v2965_v40  ;;  %2704 = vmatprep.subr.bf16.mxu0 %v2966_v43  ;;  %v3012_v40 = vld [vmem:[#allocation2 + $0x358] sm:$0xff]  }
  0x57   :  { %2726 = vmatprep.subr.bf16.mxu1 %v2967_v46  ;;  %2081 = vmatprep.mubr.bf16.mxu0 %v331_v25  ;;  %v3015_v43 = vld [vmem:[#allocation2 + $0x398] sm:$0xff]   ;;  %v3018_v46 = vld [vmem:[#allocation2 + $0x320] sm:$0xff]  }
  0x58   :  { %2121 = vmatprep.mubr.bf16.mxu1 %v333_v27  ;;  %v3051_v25 = vld [vmem:[#allocation2 + $0x4d8] sm:$0xff]  }
  0x59   :  { %2705 = vmatpush3.bf16.msra.mxu0 %v2968_v47  ;;  %v3019_v47 = vld [vmem:[#allocation2 + $0x3a0] sm:$0xff]   ;;  %v3052_v27 = vld [vmem:[#allocation2 + $0x418] sm:$0xff]  }
  0x5a   :  { %2727 = vmatpush3.bf16.msra.mxu1 %v2969_v48  ;;  %2706 = vmatprep.subr.bf16.mxu0 %v2970_v49  ;;  %v3020_v48 = vld [vmem:[#allocation2 + $0x368] sm:$0xff]  }
  0x5b   :  { %2728 = vmatprep.subr.bf16.mxu1 %v2971_v50  ;;  %v3021_v49 = vld [vmem:[#allocation2 + $0x3e8] sm:$0xff]  }
  0x5c   :  { %v3022_v50 = vld [vmem:[#allocation2 + $0x328] sm:$0xff]  }
  0x5d   :  { %2707 = vmatpush3.bf16.msra.mxu0 %v2972_v51  ;;  %v3023_v51 = vld [vmem:[#allocation2 + $0x3a8] sm:$0xff]  }
  0x5e   :  { %2729 = vmatpush3.bf16.msra.mxu1 %v2973_v52  ;;  %2708 = vmatprep.subr.bf16.mxu0 %v2974_v53  ;;  %v3024_v52 = vld [vmem:[#allocation2 + $0x370] sm:$0xff]  }
  0x5f   :  { %2730 = vmatprep.subr.bf16.mxu1 %v2975_v54  ;;  %v3025_v53 = vld [vmem:[#allocation2 + $0x3f0] sm:$0xff]  }
  0x60   :  { %v3026_v54 = vld [vmem:[#allocation2 + $0x330] sm:$0xff]  }
  0x61   :  { %2709 = vmatpush3.bf16.msra.mxu0 %v2976_v55  ;;  %v3027_v55 = vld [vmem:[#allocation2 + $0x3b0] sm:$0xff]  }
  0x62   :  { %2731 = vmatpush3.bf16.msra.mxu1 %v2977_v56  ;;  %2710 = vmatprep.subr.bf16.mxu0 %v2978_v57  ;;  %v3028_v56 = vld [vmem:[#allocation2 + $0x378] sm:$0xff]  }
  0x63   :  { %2732 = vmatprep.subr.bf16.mxu1 %v2979_v58  ;;  %v3029_v57 = vld [vmem:[#allocation2 + $0x3f8] sm:$0xff]  }
  0x64   :  { %v3030_v58 = vld [vmem:[#allocation2 + $0x338] sm:$0xff]  }
  0x65   :  { %2711 = vmatpush3.bf16.msra.mxu0 %v2980_v59  ;;  %v3031_v59 = vld [vmem:[#allocation2 + $0x3b8] sm:$0xff]  }
  0x66   :  { %2733 = vmatpush3.bf16.msra.mxu1 %v2981_v60  ;;  %2712 = vmatprep.subr.bf16.mxu0 %v2982_v61  ;;  %v3032_v60 = vld [vmem:[%s3305_s0 + $0x18] ss:$48 sps:$4 sm:$0xff]  }
  0x67   :  { %2734 = vmatprep.subr.bf16.mxu1 %v2983_v62  ;;  %v3034_v61 = vld [vmem:[%s3305_s0 + $0x78] ss:$48 sps:$4 sm:$0xff]   ;;  %v3036_v62 = vld [vmem:[%s3305_s0 + $0x1c] ss:$48 sps:$4 sm:$0xff]  }
  0x69   :  { %2713 = vmatpush3.bf16.msra.mxu0 %v2984_v63  ;;  %v3037_v63 = vld [vmem:[%s3305_s0 + $0x7c] ss:$48 sps:$4 sm:$0xff]  }
  0x6a   :  { %2735 = vmatpush3.bf16.msra.mxu1 %v2985_v0  ;;  %2714 = vmatprep.subr.bf16.mxu0 %v2986_v1  ;;  %v200_v0 = vrot.slane %v3032_v60, %v3193_v37  ;;  %v214_v1 = vrot.slane %v3034_v61, %v3193_v37 }
  0x6b   :  { %2736 = vmatprep.subr.bf16.mxu1 %v2987_v2  ;;  %v3038_v2 = vld [vmem:[#allocation2 + $0x440] sm:$0xff]  }
  0x6d   :  { %2715 = vmatpush3.bf16.msra.mxu0 %v2988_v3  ;;  %v207_v3 = vrot.slane %v3036_v62, %v3193_v37  ;;  %v3079_v62 = vld [vmem:[#allocation2 + $0x580] sm:$0xff]  }
  0x6e   :  { %2737 = vmatpush3.bf16.msra.mxu1 %v2989_v4  ;;  %2716 = vmatprep.subr.bf16.mxu0 %v2990_v5  ;;  %v221_v4 = vrot.slane %v3037_v63, %v3193_v37  ;;  %v3039_v5 = vld [vmem:[#allocation2 + $0x4c0] sm:$0xff]  }
  0x6f   :  { %2738 = vmatprep.subr.bf16.mxu1 %v2991_v6  ;;  %v223_v6 = vcombine.high %v200_v0, %v214_v1 }
  0x70   :  { %v225_v9 = vcombine.high %v207_v3, %v221_v4  ;;  %v224_v10 = vcombine.low %v207_v3, %v221_v4  ;;  %v3081_v4 = vld [vmem:[#allocation2 + $0x5c8] sm:$0xff]  }
  0x71   :  { %2717 = vmatpush3.bf16.msra.mxu0 %v2992_v7  ;;  %v222_v7 = vcombine.low %v200_v0, %v214_v1  ;;  %v335_v12 = vpack.c.bf16 %v223_v6, %v223_v6  ;;  %v3080_v1 = vld [vmem:[#allocation2 + $0x548] sm:$0xff]  }
  0x72   :  { %2739 = vmatpush3.bf16.msra.mxu1 %v2993_v8  ;;  %2746 = vmatprep.subr.bf16.mxu0 %v3000_v14  ;;  %v3040_v8 = vld [vmem:[#allocation2 + $0x400] sm:$0xff]   ;;  %v3042_v14 = vld [vmem:[#allocation2 + $0x448] sm:$0xff]   ;;  %v337_v15 = vpack.c.bf16 %v225_v9, %v225_v9  ;;  %v336_v16 = vpack.c.bf16 %v224_v10, %v224_v10  ;;  %v3086_v9 = vld [vmem:[#allocation2 + $0x510] sm:$0xff]  }
  0x73   :  { %2768 = vmatprep.subr.bf16.mxu1 %v3001_v18  ;;  %v334_v13 = vpack.c.bf16 %v222_v7, %v222_v7  ;;  %v3044_v18 = vld [vmem:[#allocation2 + $0x408] sm:$0xff]   ;;  %v3084_v7 = vld [vmem:[#allocation2 + $0x550] sm:$0xff]  }
  0x74   :  { %2082 = vmatmul.mubr.bf16.vlgmr.msra.gmra.mrb[8].mxu0 %v330_v28  ;;  %v3053_v28 = vld [vmem:[#allocation2 + $0x498] sm:$0xff]   ;;  %v3083_v6 = vld [vmem:[#allocation2 + $0x588] sm:$0xff]   ;;  %v3087_v10 = vld [vmem:[#allocation2 + $0x590] sm:$0xff]  }
  0x75   :  { %2122 = vmatmul.mubr.bf16.vlgmr.msra.gmra.mrb[8].mxu1 %v332_v29  ;;  %2747 = vmatpush3.bf16.msra.mxu0 %v3002_v23  ;;  %v3049_v23 = vld [vmem:[#allocation2 + $0x490] sm:$0xff]   ;;  %v3054_v29 = vld [vmem:[#allocation2 + $0x460] sm:$0xff]  }
  0x76   :  { %2769 = vmatpush3.bf16.msra.mxu1 %v3003_v24  ;;  %2748 = vmatprep.subr.bf16.mxu0 %v3004_v30  ;;  %v3050_v24 = vld [vmem:[#allocation2 + $0x458] sm:$0xff]   ;;  %v3055_v30 = vld [vmem:[#allocation2 + $0x4e0] sm:$0xff]  }
  0x77   :  { %2770 = vmatprep.subr.bf16.mxu1 %v3005_v31  ;;  %2161 = vmatprep.mubr.bf16.mxu0 %v335_v12  ;;  %v3056_v31 = vld [vmem:[#allocation2 + $0x420] sm:$0xff]   ;;  %v3089_v12 = vld [vmem:[#allocation2 + $0x5d8] sm:$0xff]  }
  0x78   :  { %2201 = vmatprep.mubr.bf16.mxu1 %v337_v15  ;;  %v3092_v15 = vld [vmem:[#allocation2 + $0x560] sm:$0xff]  }
  0x79   :  { %2749 = vmatpush3.bf16.msra.mxu0 %v3006_v33  ;;  %v3057_v33 = vld [vmem:[#allocation2 + $0x4a0] sm:$0xff]  }
  0x7a   :  { %2771 = vmatpush3.bf16.msra.mxu1 %v3007_v34  ;;  %2750 = vmatprep.subr.bf16.mxu0 %v3008_v35  ;;  %v3058_v34 = vld [vmem:[#allocation2 + $0x468] sm:$0xff]  }
  0x7b   :  { %2772 = vmatprep.subr.bf16.mxu1 %v3009_v36  ;;  %v3059_v35 = vld [vmem:[#allocation2 + $0x4e8] sm:$0xff]  }
  0x7c   :  { %v3060_v36 = vld [vmem:[#allocation2 + $0x428] sm:$0xff]  }
  0x7d   :  { %2751 = vmatpush3.bf16.msra.mxu0 %v3010_v38  ;;  %v3061_v38 = vld [vmem:[#allocation2 + $0x4a8] sm:$0xff]  }
  0x7e   :  { %2773 = vmatpush3.bf16.msra.mxu1 %v3011_v39  ;;  %2752 = vmatprep.subr.bf16.mxu0 %v3012_v40  ;;  %v3062_v39 = vld [vmem:[#allocation2 + $0x470] sm:$0xff]  }
  0x7f   :  { %2774 = vmatprep.subr.bf16.mxu1 %v3013_v41  ;;  %v3063_v40 = vld [vmem:[#allocation2 + $0x4f0] sm:$0xff]  }
  0x80   :  { %v3064_v41 = vld [vmem:[#allocation2 + $0x430] sm:$0xff]  }
  0x81   :  { %2753 = vmatpush3.bf16.msra.mxu0 %v3014_v42  ;;  %v3065_v42 = vld [vmem:[#allocation2 + $0x4b0] sm:$0xff]  }
  0x82   :  { %2775 = vmatpush3.bf16.msra.mxu1 %v3015_v43  ;;  %2754 = vmatprep.subr.bf16.mxu0 %v3016_v44  ;;  %v3066_v43 = vld [vmem:[#allocation2 + $0x478] sm:$0xff]  }
  0x83   :  { %2776 = vmatprep.subr.bf16.mxu1 %v3017_v45  ;;  %v3067_v44 = vld [vmem:[#allocation2 + $0x4f8] sm:$0xff]  }
  0x84   :  { %v3068_v45 = vld [vmem:[#allocation2 + $0x438] sm:$0xff]  }
  0x85   :  { %2755 = vmatpush3.bf16.msra.mxu0 %v3018_v46  ;;  %v3069_v46 = vld [vmem:[#allocation2 + $0x4b8] sm:$0xff]  }
  0x86   :  { %2777 = vmatpush3.bf16.msra.mxu1 %v3019_v47  ;;  %2756 = vmatprep.subr.bf16.mxu0 %v3020_v48  ;;  %v3070_v47 = vld [vmem:[%s3305_s0 + $0x20] ss:$48 sps:$4 sm:$0xff]  }
  0x87   :  { %2778 = vmatprep.subr.bf16.mxu1 %v3021_v49  ;;  %v3072_v48 = vld [vmem:[%s3305_s0 + $0x80] ss:$48 sps:$4 sm:$0xff]   ;;  %v3074_v49 = vld [vmem:[%s3305_s0 + $0x24] ss:$48 sps:$4 sm:$0xff]  }
  0x89   :  { %2757 = vmatpush3.bf16.msra.mxu0 %v3022_v50  ;;  %v3075_v50 = vld [vmem:[%s3305_s0 + $0x84] ss:$48 sps:$4 sm:$0xff]  }
  0x8a   :  { %2779 = vmatpush3.bf16.msra.mxu1 %v3023_v51  ;;  %2758 = vmatprep.subr.bf16.mxu0 %v3024_v52  ;;  %v236_v51 = vrot.slane %v3070_v47, %v3193_v37  ;;  %v250_v52 = vrot.slane %v3072_v48, %v3193_v37 }
  0x8b   :  { %2780 = vmatprep.subr.bf16.mxu1 %v3025_v53  ;;  %v243_v53 = vrot.slane %v3074_v49, %v3193_v37 }
  0x8d   :  { %2759 = vmatpush3.bf16.msra.mxu0 %v3026_v54  ;;  %v3076_v54 = vld [vmem:[#allocation2 + $0x540] sm:$0xff]  }
  0x8e   :  { %2781 = vmatpush3.bf16.msra.mxu1 %v3027_v55  ;;  %2760 = vmatprep.subr.bf16.mxu0 %v3028_v56  ;;  %v257_v55 = vrot.slane %v3075_v50, %v3193_v37  ;;  %v3077_v56 = vld [vmem:[#allocation2 + $0x5c0] sm:$0xff]  }
  0x8f   :  { %2782 = vmatprep.subr.bf16.mxu1 %v3029_v57  ;;  %v259_v57 = vcombine.high %v236_v51, %v250_v52 }
  0x90   :  { %v261_v60 = vcombine.high %v243_v53, %v257_v55  ;;  %v260_v61 = vcombine.low %v243_v53, %v257_v55 }
  0x91   :  { %2761 = vmatpush3.bf16.msra.mxu0 %v3030_v58  ;;  %v258_v58 = vcombine.low %v236_v51, %v250_v52  ;;  %v339_v63 = vpack.c.bf16 %v259_v57, %v259_v57 }
  0x92   :  { %2783 = vmatpush3.bf16.msra.mxu1 %v3031_v59  ;;  %2790 = vmatprep.subr.bf16.mxu0 %v3038_v2  ;;  %v3078_v59 = vld [vmem:[#allocation2 + $0x500] sm:$0xff]   ;;  %v341_v2 = vpack.c.bf16 %v261_v60, %v261_v60  ;;  %v340_v3 = vpack.c.bf16 %v260_v61, %v260_v61 }
  0x93   :  { %2812 = vmatprep.subr.bf16.mxu1 %v3039_v5  ;;  %v338_v0 = vpack.c.bf16 %v258_v58, %v258_v58  ;;  %v3082_v5 = vld [vmem:[#allocation2 + $0x508] sm:$0xff]  }
  0x94   :  { %2162 = vmatmul.mubr.bf16.vlgmr.msra.gmra.mrb[12].mxu0 %v334_v13  ;;  %v3090_v13 = vld [vmem:[#allocation2 + $0x518] sm:$0xff]  }
  0x95   :  { %2202 = vmatmul.mubr.bf16.vlgmr.msra.gmra.mrb[12].mxu1 %v336_v16  ;;  %2791 = vmatpush3.bf16.msra.mxu0 %v3040_v8  ;;  %v3085_v8 = vld [vmem:[#allocation2 + $0x5d0] sm:$0xff]   ;;  %v3093_v16 = vld [vmem:[#allocation2 + $0x5e0] sm:$0xff]  }
  0x96   :  { %2813 = vmatpush3.bf16.msra.mxu1 %v3041_v11  ;;  %2792 = vmatprep.subr.bf16.mxu0 %v3042_v14  ;;  %v3088_v11 = vld [vmem:[#allocation2 + $0x558] sm:$0xff]  }
  0x97   :  { %2814 = vmatprep.subr.bf16.mxu1 %v3043_v17  ;;  %2241 = vmatprep.mubr.bf16.mxu0 %v339_v63  ;;  %v3091_v14 = vld [vmem:[#allocation2 + $0x598] sm:$0xff]   ;;  %v3094_v17 = vld [vmem:[#allocation2 + $0x520] sm:$0xff]  }
  0x98   :  { %2281 = vmatprep.mubr.bf16.mxu1 %v341_v2 }
  0x99   :  { %2793 = vmatpush3.bf16.msra.mxu0 %v3044_v18  ;;  %v3095_v18 = vld [vmem:[#allocation2 + $0x5a0] sm:$0xff]  }
  0x9a   :  { %2815 = vmatpush3.bf16.msra.mxu1 %v3045_v19  ;;  %2794 = vmatprep.subr.bf16.mxu0 %v3046_v20  ;;  %v3096_v19 = vld [vmem:[#allocation2 + $0x568] sm:$0xff]  }
  0x9b   :  { %2816 = vmatprep.subr.bf16.mxu1 %v3047_v21  ;;  %v3097_v20 = vld [vmem:[#allocation2 + $0x5e8] sm:$0xff]  }
  0x9c   :  { %v3098_v21 = vld [vmem:[#allocation2 + $0x528] sm:$0xff]  }
  0x9d   :  { %2795 = vmatpush3.bf16.msra.mxu0 %v3048_v22  ;;  %v3099_v22 = vld [vmem:[#allocation2 + $0x5a8] sm:$0xff]  }
  0x9e   :  { %2817 = vmatpush3.bf16.msra.mxu1 %v3049_v23  ;;  %2796 = vmatprep.subr.bf16.mxu0 %v3050_v24  ;;  %v3100_v23 = vld [vmem:[#allocation2 + $0x570] sm:$0xff]  }
  0x9f   :  { %2818 = vmatprep.subr.bf16.mxu1 %v3051_v25  ;;  %v3101_v24 = vld [vmem:[#allocation2 + $0x5f0] sm:$0xff]  }
  0xa0   :  { %v3102_v25 = vld [vmem:[#allocation2 + $0x530] sm:$0xff]  }
  0xa1   :  { %2797 = vmatpush3.bf16.msra.mxu0 %v3052_v27  ;;  %v3103_v27 = vld [vmem:[#allocation2 + $0x5b0] sm:$0xff]  }
  0xa2   :  { %2819 = vmatpush3.bf16.msra.mxu1 %v3053_v28  ;;  %2798 = vmatprep.subr.bf16.mxu0 %v3054_v29  ;;  %v3104_v28 = vld [vmem:[#allocation2 + $0x578] sm:$0xff]  }
  0xa3   :  { %2820 = vmatprep.subr.bf16.mxu1 %v3055_v30  ;;  %v3105_v29 = vld [vmem:[#allocation2 + $0x5f8] sm:$0xff]  }
  0xa4   :  { %v3106_v30 = vld [vmem:[#allocation2 + $0x538] sm:$0xff]  }
  0xa5   :  { %2799 = vmatpush3.bf16.msra.mxu0 %v3056_v31  ;;  %v3107_v31 = vld [vmem:[#allocation2 + $0x5b8] sm:$0xff]  }
  0xa6   :  { %2821 = vmatpush3.bf16.msra.mxu1 %v3057_v33  ;;  %2800 = vmatprep.subr.bf16.mxu0 %v3058_v34  ;;  %v3108_v33 = vld [vmem:[%s3305_s0 + $0x28] ss:$48 sps:$4 sm:$0xff]  }
  0xa7   :  { %2822 = vmatprep.subr.bf16.mxu1 %v3059_v35  ;;  %v3110_v34 = vld [vmem:[%s3305_s0 + $0x88] ss:$48 sps:$4 sm:$0xff]   ;;  %v3112_v35 = vld [vmem:[%s3305_s0 + $0x2c] ss:$48 sps:$4 sm:$0xff]  }
  0xa9   :  { %2801 = vmatpush3.bf16.msra.mxu0 %v3060_v36  ;;  %v3113_v36 = vld [vmem:[%s3305_s0 + $0x8c] ss:$48 sps:$4 sm:$0xff]  }
  0xaa   :  { %2823 = vmatpush3.bf16.msra.mxu1 %v3061_v38  ;;  %2802 = vmatprep.subr.bf16.mxu0 %v3062_v39  ;;  %v272_v38 = vrot.slane %v3108_v33, %v3193_v37  ;;  %v286_v39 = vrot.slane %v3110_v34, %v3193_v37 }
  0xab   :  { %2824 = vmatprep.subr.bf16.mxu1 %v3063_v40  ;;  %v279_v40 = vrot.slane %v3112_v35, %v3193_v37 }
  0xad   :  { %2803 = vmatpush3.bf16.msra.mxu0 %v3064_v41  ;;  %v293_v41 = vrot.slane %v3113_v36, %v3193_v37  ;;  %v2421_v37 = vld [vmem:[%s3307_s2] ss:$0 sm:$0xff] }
  0xae   :  { %2825 = vmatpush3.bf16.msra.mxu1 %v3065_v42  ;;  %2804 = vmatprep.subr.bf16.mxu0 %v3066_v43  ;;  %v295_v42 = vcombine.high %v272_v38, %v286_v39 }
  0xaf   :  { %2826 = vmatprep.subr.bf16.mxu1 %v3067_v44  ;;  %v297_v43 = vcombine.high %v279_v40, %v293_v41  ;;  %v294_v44 = vcombine.low %v272_v38, %v286_v39 }
  0xb1   :  { %2805 = vmatpush3.bf16.msra.mxu0 %v3068_v45  ;;  %v296_v45 = vcombine.low %v279_v40, %v293_v41  ;;  %v345_v47 = vpack.c.bf16 %v297_v43, %v297_v43  ;;  %v342_v48 = vpack.c.bf16 %v294_v44, %v294_v44 }
  0xb2   :  { %2827 = vmatpush3.bf16.msra.mxu1 %v3069_v46  ;;  %2834 = vmatprep.subr.bf16.mxu0 %v3076_v54  ;;  %v343_v46 = vpack.c.bf16 %v295_v42, %v295_v42 }
  0xb3   :  { %2856 = vmatprep.subr.bf16.mxu1 %v3077_v56  ;;  %v344_v49 = vpack.c.bf16 %v296_v45, %v296_v45 }
  0xb4   :  { %2242 = vmatmul.mubr.bf16.vlgmr.msra.gmra.mrb[16].mxu0 %v338_v0 }
  0xb5   :  { %2282 = vmatmul.mubr.bf16.vlgmr.msra.gmra.mrb[16].mxu1 %v340_v3  ;;  %2835 = vmatpush3.bf16.msra.mxu0 %v3078_v59 }
  0xb6   :  { %2857 = vmatpush3.bf16.msra.mxu1 %v3079_v62  ;;  %2836 = vmatprep.subr.bf16.mxu0 %v3080_v1 }
  0xb7   :  { %2858 = vmatprep.subr.bf16.mxu1 %v3081_v4  ;;  %2321 = vmatprep.mubr.bf16.mxu0 %v343_v46 }
  0xb8   :  { %2361 = vmatprep.mubr.bf16.mxu1 %v345_v47 }
  0xb9   :  { %2837 = vmatpush3.bf16.msra.mxu0 %v3082_v5 }
  0xba   :  { %2859 = vmatpush3.bf16.msra.mxu1 %v3083_v6  ;;  %2838 = vmatprep.subr.bf16.mxu0 %v3084_v7 }
  0xbb   :  { %2860 = vmatprep.subr.bf16.mxu1 %v3085_v8 }
  0xbd   :  { %2839 = vmatpush3.bf16.msra.mxu0 %v3086_v9 }
  0xbe   :  { %2861 = vmatpush3.bf16.msra.mxu1 %v3087_v10  ;;  %2840 = vmatprep.subr.bf16.mxu0 %v3088_v11  ;;  %v3146_v10 = vmov 0  }
  0xbf   :  { %2862 = vmatprep.subr.bf16.mxu1 %v3089_v12  ;;  %2885 = vset.pattern.permute.xlu0 %v3146_v10 }
  0xc1   :  { %2841 = vmatpush3.bf16.msra.mxu0 %v3090_v13 }
  0xc2   :  { %2863 = vmatpush3.bf16.msra.mxu1 %v3091_v14  ;;  %2842 = vmatprep.subr.bf16.mxu0 %v3092_v15 }
  0xc3   :  { %2864 = vmatprep.subr.bf16.mxu1 %v3093_v16 }
  0xc5   :  { %2843 = vmatpush3.bf16.msra.mxu0 %v3094_v17 }
  0xc6   :  { %2865 = vmatpush3.bf16.msra.mxu1 %v3095_v18  ;;  %2844 = vmatprep.subr.bf16.mxu0 %v3096_v19 }
  0xc7   :  { %2866 = vmatprep.subr.bf16.mxu1 %v3097_v20 }
  0xc9   :  { %2845 = vmatpush3.bf16.msra.mxu0 %v3098_v21 }
  0xca   :  { %2867 = vmatpush3.bf16.msra.mxu1 %v3099_v22  ;;  %2846 = vmatprep.subr.bf16.mxu0 %v3100_v23 }
  0xcb   :  { %2868 = vmatprep.subr.bf16.mxu1 %v3101_v24 }
  0xcd   :  { %2847 = vmatpush3.bf16.msra.mxu0 %v3102_v25 }
  0xce   :  { %2869 = vmatpush3.bf16.msra.mxu1 %v3103_v27  ;;  %2848 = vmatprep.subr.bf16.mxu0 %v3104_v28 }
  0xcf   :  { %2870 = vmatprep.subr.bf16.mxu1 %v3105_v29 }
  0xd1   :  { %2849 = vmatpush3.bf16.msra.mxu0 %v3106_v30 }
  0xd2   :  { %2871 = vmatpush3.bf16.msra.mxu1 %v3107_v31 }
  0xd4   :  { %2322 = vmatmul.mubr.bf16.vlgmr.msra.gmra.mrb[20].mxu0 %v342_v48 }
  0xd5   :  { %2362 = vmatmul.mubr.bf16.vlgmr.msra.gmra.mrb[20].mxu1 %v344_v49 }
 0x107   :  { %v2630_v50 = vpop.f32.mrb[0].mxu0 }
 0x108   :  { %v2652_v51 = vpop.f32.mrb[0].mxu1  ;;  %v2631_v52 = vpop.f32.mrb[1].mxu0 }
 0x109   :  { %v2632_v53 = vadd.f32 %v2631_v52, %v2630_v50  ;;  %v2653_v54 = vpop.f32.mrb[1].mxu1  ;;  %v2633_v55 = vpop.f32.mrb[2].mxu0 }
 0x10a   :  { %v2654_v56 = vadd.f32 %v2653_v54, %v2652_v51  ;;  %v2655_v57 = vpop.f32.mrb[2].mxu1  ;;  %v2634_v58 = vpop.f32.mrb[3].mxu0 }
 0x10b   :  { %v1924_v59 = vadd.f32 %v2632_v53, %v2421_v37  ;;  %v2656_v60 = vpop.f32.mrb[3].mxu1 }
 0x10d   :  { %v1964_v61 = vadd.f32 %v2654_v56, %v1924_v59 }
 0x127   :  { %v2674_v62 = vpop.f32.mrb[4].mxu0 }
 0x128   :  { %v2696_v63 = vpop.f32.mrb[4].mxu1  ;;  %v2675_v0 = vpop.f32.mrb[5].mxu0 }
 0x129   :  { %v2676_v1 = vadd.f32 %v2675_v0, %v2674_v62  ;;  %v2697_v2 = vpop.f32.mrb[5].mxu1  ;;  %v2677_v3 = vpop.f32.mrb[6].mxu0  ;;  %v2383_v62 = vld [vmem:[%s3308_s3] sm:$0xff] }
 0x12a   :  { %v2698_v4 = vadd.f32 %v2697_v2, %v2696_v63  ;;  %v2699_v5 = vpop.f32.mrb[6].mxu1  ;;  %v2678_v6 = vpop.f32.mrb[7].mxu0  ;;  %v2382_v2 = vand.u32 127, %v89_v26 }
 0x12b   :  { %v2004_v7 = vadd.f32 %v2676_v1, %v1964_v61  ;;  %v2700_v8 = vpop.f32.mrb[7].mxu1 }
 0x12d   :  { %v2044_v9 = vadd.f32 %v2698_v4, %v2004_v7 }
 0x147   :  { %v2718_v11 = vpop.f32.mrb[8].mxu0 }
 0x148   :  { %v2740_v12 = vpop.f32.mrb[8].mxu1  ;;  %v2719_v13 = vpop.f32.mrb[9].mxu0 }
 0x149   :  { %v2741_v14 = vpop.f32.mrb[9].mxu1  ;;  %v2720_v15 = vadd.f32 %v2719_v13, %v2718_v11  ;;  %v2721_v17 = vpop.f32.mrb[10].mxu0 }
 0x14a   :  { %v2742_v16 = vadd.f32 %v2741_v14, %v2740_v12  ;;  %v2743_v18 = vpop.f32.mrb[10].mxu1  ;;  %v2722_v19 = vpop.f32.mrb[11].mxu0 }
 0x14b   :  { %v2744_v20 = vpop.f32.mrb[11].mxu1  ;;  %v2084_v21 = vadd.f32 %v2720_v15, %v2044_v9 }
 0x14d   :  { %v2124_v22 = vadd.f32 %v2742_v16, %v2084_v21 }
 0x167   :  { %v2762_v23 = vpop.f32.mrb[12].mxu0 }
 0x168   :  { %v2784_v24 = vpop.f32.mrb[12].mxu1  ;;  %v2763_v25 = vpop.f32.mrb[13].mxu0 }
 0x169   :  { %v2764_v27 = vadd.f32 %v2763_v25, %v2762_v23  ;;  %v2785_v28 = vpop.f32.mrb[13].mxu1  ;;  %v2765_v29 = vpop.f32.mrb[14].mxu0 }
 0x16a   :  { %v2786_v30 = vadd.f32 %v2785_v28, %v2784_v24  ;;  %v2787_v31 = vpop.f32.mrb[14].mxu1  ;;  %v2766_v33 = vpop.f32.mrb[15].mxu0 }
 0x16b   :  { %v2164_v34 = vadd.f32 %v2764_v27, %v2124_v22  ;;  %v2788_v35 = vpop.f32.mrb[15].mxu1 }
 0x16d   :  { %v2204_v36 = vadd.f32 %v2786_v30, %v2164_v34 }
 0x187   :  { %v2806_v38 = vpop.f32.mrb[16].mxu0 }
 0x188   :  { %v2828_v39 = vpop.f32.mrb[16].mxu1  ;;  %v2807_v40 = vpop.f32.mrb[17].mxu0 }
 0x189   :  { %v2808_v41 = vadd.f32 %v2807_v40, %v2806_v38  ;;  %v2829_v42 = vpop.f32.mrb[17].mxu1  ;;  %v2809_v43 = vpop.f32.mrb[18].mxu0 }
 0x18a   :  { %v2830_v44 = vadd.f32 %v2829_v42, %v2828_v39  ;;  %v2831_v45 = vpop.f32.mrb[18].mxu1  ;;  %v2810_v46 = vpop.f32.mrb[19].mxu0 }
 0x18b   :  { %v2244_v47 = vadd.f32 %v2808_v41, %v2204_v36  ;;  %v2832_v48 = vpop.f32.mrb[19].mxu1 }
 0x18d   :  { %v2284_v49 = vadd.f32 %v2830_v44, %v2244_v47 }
 0x1a7   :  { %v2850_v50 = vpop.f32.mrb[20].mxu0 }
 0x1a8   :  { %v2872_v51 = vpop.f32.mrb[20].mxu1  ;;  %v2851_v37 = vpop.f32.mrb[21].mxu0 }
 0x1a9   :  { %v2873_v52 = vpop.f32.mrb[21].mxu1  ;;  %v2852_v53 = vadd.f32 %v2851_v37, %v2850_v50  ;;  %v2853_v55 = vpop.f32.mrb[22].mxu0 }
 0x1aa   :  { %v2874_v54 = vadd.f32 %v2873_v52, %v2872_v51  ;;  %v2875_v56 = vpop.f32.mrb[22].mxu1  ;;  %v2854_v57 = vpop.f32.mrb[23].mxu0 }
 0x1ab   :  { %v2876_v58 = vpop.f32.mrb[23].mxu1  ;;  %v2324_v59 = vadd.f32 %v2852_v53, %v2284_v49 }
 0x1ad   :  { %v2364_v60 = vadd.f32 %v2874_v54, %v2324_v59 }
 0x1af   :  { %v2369_v61 = vpack.c.bf16 %v2364_v60, %v2364_v60  ;;  %2371 = vmax.xlane.f32.xlu0 %v2364_v60 }
 0x1b1   :  { %2370 = vst [vmem:[%s3309_s4] sm:$0xf] %v2369_v61 }
 0x1c5   :  { %2385 = vperm.xlu0 %2885, %v2383_v62  }
 0x23c   :  { %v2372_v63 = vpop.xlane.xlu0 %2371 }
 0x23d   :  { %v2373_v0 = vsub.f32 %v2364_v60, %v2372_v63 }
 0x23f   :  { %v2374_v1 = vmul.f32 1.442695, %v2373_v0 }
 0x241   :  { %3114 = vpow2.f32 %v2374_v1 }
 0x244   :  { %v2386_v3 = vpop.permute.xlu0 %2385 }
 0x245   :  { %vm2387_vm0 = vcmp.eq.s32.totalorder %v2382_v2, %v2386_v3 }
 0x246   :  { %v2388_v5 = vsel %vm2387_vm0, %v2364_v60, 0.0 }
 0x24b   :  { %v3115_v4 = vpop.eup %3114 }
 0x24c   :  { %2376 = vadd.xlane.f32.xlu1 %v3115_v4 }
 0x250   :  { %2389 = vadd.xlane.f32.xlu1 %v2388_v5 }
 0x2d9   :  { %v2377_v6 = vpop.xlane.xlu1 %2376 }
 0x2da   :  { %3116 = vlog2.f32 %v2377_v6 }
 0x2dd   :  { %v2390_v10 = vpop.xlane.xlu1 %2389 }
 0x2e4   :  { %v3117_v7 = vpop.eup %3116 }
 0x2e5   :  { %v2379_v8 = vmul.f32 0.6931472, %v3117_v7 }
 0x2e7   :  { %v2380_v9 = vadd.f32 %v2379_v8, %v2372_v63 }
 0x2e9   :  { %v2391_v11 = vsub.f32 %v2380_v9, %v2390_v10 }
 0x2eb   :  { %v2398_v12 = vsel %vm2397_vm1, %v2391_v11, 0.0 }
 0x2ec   :  { %v2400_v13 = vsel %vm2399_vm2, %v2398_v12, 0.0 }
 0x2ed   :  { %2401 = vadd.xlane.f32.xlu1 %v2400_v13 }
 0x37a   :  { %v2402_v26 = vpop.xlane.xlu1 %2401 }
 0x37b   :  { %v2403_v14 = vrot.slane %v2402_v26, 4 }
 0x37d   :  { %v2404_v15 = vadd.f32 %v2403_v14, %v2402_v26 }
 0x37f   :  { %v2405_v16 = vrot.slane %v2404_v15, 2 }
 0x381   :  { %v2406_v17 = vadd.f32 %v2405_v16, %v2404_v15 }
 0x383   :  { %v2407_v18 = vrot.slane %v2406_v17, 1 }
 0x385   :  { %v2408_v19 = vadd.f32 %v2407_v18, %v2406_v17 }
 0x387   :  { %2878 = vpush %v2408_v19 }
 0x3b8   :  { %s2879_s3 = spop %2878 }
 0x3b9   :  { %v2410_v20 = vstv %s2879_s3 }
 0x3ba   :  { %2411 = vst [vmem:[%s3310_s5] sm:$0xff] %v2410_v20 }
 0x3bb   :  { %2420 = vsyncpa [#allocation3], 1 }

</bundles_post_ra>
